<compile_context>
chip_gen: v6e
topology: v6e:2x2x1
jax: 0.10.0
libtpu: 0.0.40
codegen_flags: <defaults>
</compile_context>

<pallas_src>
import functools

import jax
import jax.numpy as jnp
from jax.experimental import pallas as pl
from jax.experimental.pallas import tpu as pltpu

_LANE = 128
_SUBLANE = 8


def _chip_config():
    """Returns (block_rows_for_f32, num_partials) tuned per TPU generation."""
    kind = ""
    try:
        kind = jax.devices()[0].device_kind.lower()
    except Exception:
        pass
    if "v7" in kind:
        # 2 TCs, ~3.2 TB/s HBM: large blocks amortize the ~0.35us/step overhead.
        # 8192 rows = 4 MiB/input/buffer -> 16 MiB double-buffered, well under
        # the 64 MiB physical VMEM ceiling. Do NOT raise to 16384 rows.
        return 8192, 2
    if "v5e" in kind or "v5 lite" in kind or "v5lite" in kind:
        # v5e default scoped VMEM is 16 MiB: 4096 rows -> 8 MiB total inputs.
        return 4096, 1
    # v6e and default: single TC, 128 MiB physical VMEM.
    return 8192, 1


def _mse_partial_kernel(p_ref, t_ref, o_ref, *, n_rows, block_rows,
                        blocks_per_core, needs_mask):
    c = pl.program_id(0)   # parallel axis: per-core partial
    i = pl.program_id(1)   # arbitrary axis: reduction over row-blocks

    @pl.when(i == 0)
    def _():
        o_ref[...] = jnp.zeros_like(o_ref)

    # Cast per-tile; inputs stream at their native dtype (bf16 = half bytes).
    d = p_ref[...].astype(jnp.float32) - t_ref[...].astype(jnp.float32)
    sq = (d * d).reshape(block_rows // _SUBLANE, _SUBLANE, _LANE)

    if needs_mask:
        # Valid rows always end on an 8-row boundary, so mask whole (8,128)
        # row-groups (cheap (G,1,1) iota+select) instead of per-element.
        # Keep the where BEFORE the sum: it is a select, so NaN/Inf read from
        # unspecified ragged-block VMEM is discarded, not propagated.
        blk = c * blocks_per_core + i
        row0 = blk * block_rows
        grp_row = row0 + _SUBLANE * jax.lax.broadcasted_iota(
            jnp.int32, (block_rows // _SUBLANE, 1, 1), 0)
        sq = jnp.where(grp_row < n_rows, sq, 0.0)

    # Fold the block's row-groups into an (8, 128) vreg-shaped partial:
    # pure VPU elementwise adds, no per-step cross-lane reduce.
    o_ref[...] += sq.sum(axis=0)[None]


def gan_loss(pred, target, *, force_pallas=False):
    """MSE loss (mean reduction) between pred and target, any matching shape."""
    assert pred.shape == target.shape, "pred/target shapes must match"
    n_elements = int(pred.size)
    if n_elements == 0:
        return jnp.float32(jnp.nan)

    itemsize = jnp.dtype(pred.dtype).itemsize

    # Small-input fallback: below a few MiB the pallas_call launch + pipeline
    # prologue dominates; a fused XLA elementwise+reduce is strictly faster.
    if not force_pallas and n_elements * itemsize < (2 << 20):
        d = pred.astype(jnp.float32) - target.astype(jnp.float32)
        return jnp.mean(d * d)

    p = pred.reshape(-1)
    t = target.reshape(-1)

    # dtype-aware alignment: sub-32-bit dtypes pack 2-4 rows per sublane, so
    # align the Pallas prefix to the native packed tile (16 rows bf16, 32 int8).
    pack = max(1, 4 // itemsize)
    row_align = _SUBLANE * pack
    chunk = row_align * _LANE

    # No jnp.pad: only the chunk-aligned prefix is streamed through Pallas;
    # the tiny tail is reduced in plain JAX (O(chunk) elements).
    n_aligned = (n_elements // chunk) * chunk
    tail_sum = jnp.float32(0.0)
    if n_aligned < n_elements:
        dt = p[n_aligned:].astype(jnp.float32) - t[n_aligned:].astype(jnp.float32)
        tail_sum = jnp.sum(dt * dt)
    if n_aligned == 0:
        return tail_sum / jnp.float32(n_elements)

    rows = n_aligned // _LANE                      # multiple of row_align
    p2 = p[:n_aligned].reshape(rows, _LANE)
    t2 = t[:n_aligned].reshape(rows, _LANE)

    cfg_block_rows_f32, cfg_partials = _chip_config()
    # Byte-equal blocks for narrow dtypes so each step still moves ~4 MiB.
    block_rows = min(cfg_block_rows_f32 * pack, rows)
    n_blocks = (rows + block_rows - 1) // block_rows
    num_partials = min(cfg_partials, n_blocks)
    blocks_per_core = (n_blocks + num_partials - 1) // num_partials
    needs_mask = (num_partials * blocks_per_core * block_rows) != rows

    def in_map(c, i):
        blk = c * blocks_per_core + i
        # Clamp over-covered block indices; their contribution is masked to 0.
        return (jnp.minimum(blk, n_blocks - 1), 0)

    kernel = functools.partial(
        _mse_partial_kernel,
        n_rows=rows,
        block_rows=block_rows,
        blocks_per_core=blocks_per_core,
        needs_mask=needs_mask,
    )

    block_bytes = block_rows * _LANE * itemsize
    # 2 inputs x 2 pipeline buffers + output/scratch headroom.
    vmem_limit = int(4 * block_bytes + (8 << 20))

    partials = pl.pallas_call(
        kernel,
        out_shape=jax.ShapeDtypeStruct((num_partials, _SUBLANE, _LANE),
                                       jnp.float32),
        grid_spec=pltpu.PrefetchScalarGridSpec(
            num_scalar_prefetch=0,
            grid=(num_partials, blocks_per_core),
            in_specs=[
                pl.BlockSpec((block_rows, _LANE), in_map),
                pl.BlockSpec((block_rows, _LANE), in_map),
            ],
            out_specs=pl.BlockSpec((1, _SUBLANE, _LANE),
                                   lambda c, i: (c, 0, 0)),
        ),
        compiler_params=pltpu.CompilerParams(
            dimension_semantics=("parallel", "arbitrary"),
            vmem_limit_bytes=vmem_limit,
        ),
        cost_estimate=pl.CostEstimate(
            flops=3 * n_aligned,
            bytes_accessed=int(2 * n_aligned * itemsize
                               + num_partials * _SUBLANE * _LANE * 4),
            transcendentals=0,
        ),
    )(p2, t2)

    # Single cross-lane reduce + division by the true element count.
    return (jnp.sum(partials) + tail_sum) / jnp.float32(n_elements)


if __name__ == "__main__":
    key = jax.random.PRNGKey(0)
    k1, k2, k3, k4 = jax.random.split(key, 4)

    # Discriminator-style output and its GAN target map (NCHW), 2048 elements.
    pred = jax.random.normal(k1, (2, 4, 16, 16), dtype=jnp.float32)
    target = jax.random.normal(k2, (2, 4, 16, 16), dtype=jnp.float32)

    loss = gan_loss(pred, target, force_pallas=True)
    jax.block_until_ready(loss)
    ref = jnp.mean((pred - target) ** 2)
    assert jnp.allclose(loss, ref, rtol=1e-5, atol=1e-6), (loss, ref)

    # Non-1024-aligned size: exercises the aligned-prefix + plain-JAX tail path.
    pred2 = jax.random.normal(k3, (3, 5, 7, 11), dtype=jnp.float32)
    target2 = jax.random.normal(k4, (3, 5, 7, 11), dtype=jnp.float32)
    loss2 = gan_loss(pred2, target2, force_pallas=True)
    jax.block_until_ready(loss2)
    ref2 = jnp.mean((pred2 - target2) ** 2)
    assert jnp.allclose(loss2, ref2, rtol=1e-5, atol=1e-6), (loss2, ref2)

    print("KERNEL_OK")
</pallas_src>

<mosaic_0001>
module attributes {stable_mosaic.version = 11 : i64} {
  func.func @_mse_partial_kernel(%arg0: i32, %arg1: i32, %arg2: memref<16x128xf32, #tpu.memory_space<vmem>>, %arg3: memref<16x128xf32, #tpu.memory_space<vmem>>, %arg4: memref<1x8x128xf32, #tpu.memory_space<vmem>>) attributes {dimension_semantics = [#tpu.dimension_semantics<parallel>, #tpu.dimension_semantics<arbitrary>], iteration_bounds = array<i64: 1, 1>, scalar_prefetch = 0 : i64, scratch_operands = 0 : i64, tpu.core_type = #tpu.core_type<tc>, window_params = [{transform_indices = @transform_0, window_bounds = array<i64: 16, 128>}, {transform_indices = @transform_1, window_bounds = array<i64: 16, 128>}, {transform_indices = @transform_2, window_bounds = array<i64: 1, 8, 128>}]} {
    %c0_i32 = arith.constant 0 : i32
    %0 = arith.cmpi eq, %arg1, %c0_i32 : i32
    %1 = arith.extui %0 : i1 to i32
    %c0_i32_0 = arith.constant 0 : i32
    %2 = arith.cmpi ne, %1, %c0_i32_0 : i32
    scf.if %2 {
      %cst_10 = arith.constant 0.000000e+00 : f32
      %13 = vector.broadcast %cst_10 : f32 to vector<1x8x128xf32>
      %c0_11 = arith.constant 0 : index
      %c0_12 = arith.constant 0 : index
      %c0_13 = arith.constant 0 : index
      %14 = vector.load %arg4[%c0_11, %c0_12, %c0_13] : memref<1x8x128xf32, #tpu.memory_space<vmem>>, vector<1x8x128xf32>
      tpu.vector_store %arg4[%c0_11, %c0_12, %c0_13], %13 {strides = array<i32>} : memref<1x8x128xf32, #tpu.memory_space<vmem>>, vector<1x8x128xf32>,
    } else {
    }
    %c0 = arith.constant 0 : index
    %c0_1 = arith.constant 0 : index
    %3 = vector.load %arg2[%c0, %c0_1] : memref<16x128xf32, #tpu.memory_space<vmem>>, vector<16x128xf32>
    %c0_2 = arith.constant 0 : index
    %c0_3 = arith.constant 0 : index
    %4 = vector.load %arg3[%c0_2, %c0_3] : memref<16x128xf32, #tpu.memory_space<vmem>>, vector<16x128xf32>
    %5 = arith.subf %3, %4 : vector<16x128xf32>
    %6 = arith.mulf %5, %5 : vector<16x128xf32>
    %7 = vector.shape_cast %6 : vector<16x128xf32> to vector<2x8x128xf32>
    %c0_4 = arith.constant 0 : index
    %c0_5 = arith.constant 0 : index
    %c0_6 = arith.constant 0 : index
    %8 = vector.load %arg4[%c0_4, %c0_5, %c0_6] : memref<1x8x128xf32, #tpu.memory_space<vmem>>, vector<1x8x128xf32>
    %cst = arith.constant dense<0.000000e+00> : vector<8x128xf32>
    %9 = vector.multi_reduction <add>, %7, %cst [0] : vector<2x8x128xf32> to vector<8x128xf32>
    %10 = vector.shape_cast %9 : vector<8x128xf32> to vector<1x8x128xf32>
    %11 = arith.addf %8, %10 : vector<1x8x128xf32>
    %c0_7 = arith.constant 0 : index
    %c0_8 = arith.constant 0 : index
    %c0_9 = arith.constant 0 : index
    %12 = vector.load %arg4[%c0_7, %c0_8, %c0_9] : memref<1x8x128xf32, #tpu.memory_space<vmem>>, vector<1x8x128xf32>
    tpu.vector_store %arg4[%c0_7, %c0_8, %c0_9], %11 {strides = array<i32>} : memref<1x8x128xf32, #tpu.memory_space<vmem>>, vector<1x8x128xf32>,
    return
  }
  func.func @transform_0(%arg0: i32, %arg1: i32) -> (i32, i32) {
    %c1_i32 = arith.constant 1 : i32
    %0 = arith.muli %arg0, %c1_i32 : i32
    %1 = arith.addi %0, %arg1 : i32
    %c0_i32 = arith.constant 0 : i32
    %2 = arith.minsi %1, %c0_i32 : i32
    %c0_i32_0 = arith.constant 0 : i32
    %c0_i32_1 = arith.constant 0 : i32
    return %2, %c0_i32_0 : i32, i32
  }
  func.func @transform_1(%arg0: i32, %arg1: i32) -> (i32, i32) {
    %c1_i32 = arith.constant 1 : i32
    %0 = arith.muli %arg0, %c1_i32 : i32
    %1 = arith.addi %0, %arg1 : i32
    %c0_i32 = arith.constant 0 : i32
    %2 = arith.minsi %1, %c0_i32 : i32
    %c0_i32_0 = arith.constant 0 : i32
    %c0_i32_1 = arith.constant 0 : i32
    return %2, %c0_i32_0 : i32, i32
  }
  func.func @transform_2(%arg0: i32, %arg1: i32) -> (i32, i32, i32) {
    %c0_i32 = arith.constant 0 : i32
    %c0_i32_0 = arith.constant 0 : i32
    %c0_i32_1 = arith.constant 0 : i32
    return %arg0, %c0_i32, %c0_i32_0 : i32, i32, i32
  }
}

</mosaic_0001>

<bundles_post_ra>
// kernel: tpu_custom_call.1
= control target key start
LH: loop header
LB: loop body
LE: loop exit
PB: predicated region body
PF: predicated region fallthrough
CT: control target
= control target key end

     0   :  { %7 = vsyncpa [#allocation3], 0  ;;  %s198_s0 = inlined_call_operand.hbm [shape: f32[16,128], index: 0, kind: input, shape index: {}]   ;;  %s199_s1 = inlined_call_operand.hbm [shape: f32[16,128], index: 1, kind: input, shape index: {}]   ;;  %s200_s2 = inlined_call_operand.hbm [shape: f32[1,8,128], index: 2, kind: output, shape index: {}]  }
   0x1   :  { %8 = vsyncpa [#allocation6], 0 }
   0x2   :  { %9 = vsyncpa [#allocation4], 0  ;;  %s169_s9 = smov [#allocation2]  }
   0x3   :  { %s21_s10 = sshll.u32 %s169_s9, 4  ;;  %s22_s10 = int_to_ptr.vmem [resolvable:$true] %s21_s10 }
   0x4   :  { %s111_s11 = scalar_lea.vmem %s22_s10, 256  ;;  %p116_p1 = scmp.lt.s32.totalorder %s22_s10, %s22_s10 }
   0x5   :  { %p112_p0 = scmp.ne.s32.totalorder %s22_s10, %s111_s11  ;;  %p117_p2 = scmp.lt.s32.totalorder %s111_s11, %s111_s11 }
   0x7   :  { %p118_p3 = por %p117_p2, %p116_p1 }
   0x9   :  { %p119_p4 = pnand %p118_p3, %p112_p0 }
   0xb   :  { %122 = shalt.err (!%p119_p4)
}
   0xc   :  { %s170_s12 = smov 128   ;;  %s171_s13 = smov 8  }
   0xd   :  { %27 = dma.hbm_to_vmem [thread:$0]  %s198_s0, 256, %s22_s10, [#allocation3], %s170_s12, %s170_s12, %s171_s13  }
   0xe   :  { %s172_s16 = smov [#allocation5]  }
   0xf   :  { %s39_s17 = sshll.u32 %s172_s16, 4  ;;  %s40_s17 = int_to_ptr.vmem [resolvable:$true] %s39_s17 }
  0x10   :  { %s131_s18 = scalar_lea.vmem %s40_s17, 256  ;;  %p136_p6 = scmp.lt.s32.totalorder %s40_s17, %s40_s17 }
  0x11   :  { %p132_p5 = scmp.ne.s32.totalorder %s40_s17, %s131_s18  ;;  %p137_p7 = scmp.lt.s32.totalorder %s131_s18, %s131_s18 }
  0x13   :  { %p138_p8 = por %p137_p7, %p136_p6 }
  0x15   :  { %p139_p9 = pnand %p138_p8, %p132_p5 }
  0x17   :  { %142 = shalt.err (!%p139_p9)
}
  0x18   :  { %45 = dma.hbm_to_vmem [thread:$0]  %s199_s1, 256, %s40_s17, [#allocation6], %s170_s12, %s170_s12, %s171_s13  }
  0x19   :  { %163 = dma.done.wait [#allocation3], 256  }
  0x1a   :  { %164 = vsyncadd [#allocation3], 4294967040 }
  0x1b   :  { %165 = dma.done.wait [#allocation6], 256  }
  0x1c   :  { %166 = vsyncadd [#allocation6], 4294967040  ;;  %v65_v0 = vld [vmem:[#allocation2] sm:$0xff]  ;;  %v66_v1 = vld [vmem:[#allocation2 + $0x8] sm:$0xff]  ;;  %s173_s0 = smov [#allocation7]  }
  0x1d   :  { %v67_v2 = vld [vmem:[#allocation5] sm:$0xff]  ;;  %v68_v3 = vld [vmem:[#allocation5 + $0x8] sm:$0xff]  ;;  %s83_s21 = sshll.u32 %s173_s0, 4  ;;  %s84_s21 = int_to_ptr.vmem [resolvable:$true] %s83_s21 }
  0x1e   :  { %v69_v4 = vsub.f32 %v65_v0, %v67_v2  ;;  %v70_v5 = vsub.f32 %v66_v1, %v68_v3  ;;  %s143_s22 = scalar_lea.vmem %s84_s21, 128  ;;  %p148_p11 = scmp.lt.s32.totalorder %s84_s21, %s84_s21 }
  0x1f   :  { %p144_p10 = scmp.ne.s32.totalorder %s84_s21, %s143_s22  ;;  %p149_p12 = scmp.lt.s32.totalorder %s143_s22, %s143_s22 }
  0x20   :  { %v71_v6 = vmul.f32 %v69_v4, %v69_v4  ;;  %v72_v7 = vmul.f32 %v70_v5, %v70_v5 }
  0x21   :  { %p150_p13 = por %p149_p12, %p148_p11 }
  0x22   :  { %v74_v8 = vadd.f32 %v72_v7, %v71_v6 }
  0x23   :  { %p151_p0 = pnand %p150_p13, %p144_p10 }
  0x24   :  { %76 = vst [vmem:[#allocation7] sm:$0xff] %v74_v8 }
  0x25   :  { %154 = shalt.err (!%p151_p0)
}
  0x26   :  { %86 = dma.vmem_to_hbm [thread:$0]  %s84_s21, 128, %s200_s2, [#allocation4]  }
  0x27   :  { %167 = dma.done.wait [#allocation4], 128  }
  0x28   :  { %168 = vsyncadd [#allocation4], 4294967168 }
  0x29   :  { %90 = vsyncpa [#allocation3], 1 }
  0x2a   :  { %91 = vsyncpa [#allocation6], 1 }
  0x2b   :  { %92 = vsyncpa [#allocation4], 1 }

</bundles_post_ra>
